<compile_context>
chip_gen: v6e
topology: v6e:2x2x1
jax: 0.10.0
libtpu: 0.0.40
codegen_flags: <defaults>
</compile_context>

<pallas_src>
import jax
import jax.numpy as jnp
from jax.experimental import pallas as pl
from jax.experimental.pallas import tpu as pltpu

NEG_SLOPE = 0.01


def _leaky_relu(x):
    # max(x, a*x) == LeakyReLU(a) for 0 < a < 1
    return jnp.maximum(x, NEG_SLOPE * x)


def _round_up(n, m):
    return ((n + m - 1) // m) * m


# ---------------------------------------------------------------------------
# Kernel
# ---------------------------------------------------------------------------
def modelv1_kernel(
    x_ref,
    w1_ref, t1_ref,
    w2_ref, t2_ref,
    w3_ref, t3_ref,
    w4_ref, t4_ref,
    w5_ref, b5_ref,
    out_ref,
):
    f32 = jnp.float32
    cdt = w1_ref.dtype  # MXU input dtype (f32 or bf16); accumulation is always f32

    # bn0 + dropout0 are folded into w1 / w2[:F] / t1 / t2 (eval mode) -> use x directly.
    x0c = x_ref[...].astype(cdt)

    # block 1: dense1 + bn1
    x1 = _leaky_relu(jnp.dot(x0c, w1_ref[...], preferred_element_type=f32) + t1_ref[...])
    x1c = x1.astype(cdt)

    # block 2: dense2(concat[x0, x1]) + bn2   (single K=F+H matmul; lane concat -> XLU)
    c01 = jnp.concatenate([x0c, x1c], axis=-1)
    x2 = _leaky_relu(jnp.dot(c01, w2_ref[...], preferred_element_type=f32) + t2_ref[...])
    x2c = x2.astype(cdt)

    # block 3: dense3(concat[x1, x2]) + bn3
    c12 = jnp.concatenate([x1c, x2c], axis=-1)
    x3 = _leaky_relu(jnp.dot(c12, w3_ref[...], preferred_element_type=f32) + t3_ref[...])
    x3c = x3.astype(cdt)

    # block 4: dense4(concat[x2, x3]) + bn4
    c23 = jnp.concatenate([x2c, x3c], axis=-1)
    x4 = _leaky_relu(jnp.dot(c23, w4_ref[...], preferred_element_type=f32) + t4_ref[...])
    x4c = x4.astype(cdt)

    # dense5(concat[x3, x4]); output stays at its true width T (no lane padding)
    c34 = jnp.concatenate([x3c, x4c], axis=-1)
    out = jnp.dot(c34, w5_ref[...], preferred_element_type=f32) + b5_ref[...]
    out_ref[...] = out.astype(out_ref.dtype)


# ---------------------------------------------------------------------------
# Wrapper-side parameter folding (BN folds, bn0 absorbed into w1 / w2[:F])
# ---------------------------------------------------------------------------
def prepare_params(raw, *, compute_dtype=jnp.float32, eps=1e-5):
    f32 = jnp.float32

    def bn_fold(g, b, m, v):
        s = (g / jnp.sqrt(v + eps)).astype(f32)
        return s, (b - m * s).astype(f32)

    s0, t0 = bn_fold(raw["bn0_g"], raw["bn0_b"], raw["bn0_m"], raw["bn0_v"])
    s1, sh1 = bn_fold(raw["bn1_g"], raw["bn1_b"], raw["bn1_m"], raw["bn1_v"])
    s2, sh2 = bn_fold(raw["bn2_g"], raw["bn2_b"], raw["bn2_m"], raw["bn2_v"])
    s3, sh3 = bn_fold(raw["bn3_g"], raw["bn3_b"], raw["bn3_m"], raw["bn3_v"])
    s4, sh4 = bn_fold(raw["bn4_g"], raw["bn4_b"], raw["bn4_m"], raw["bn4_v"])

    F = raw["w1"].shape[0]

    # dense1 + bn1, with bn0 folded in:
    #   y1 = x @ (s0[:,None] * W1 * s1) + (t0 @ (W1*s1) + b1*s1 + sh1)
    w1s = raw["w1"].astype(f32) * s1[None, :]
    w1f = s0[:, None] * w1s
    t1 = t0 @ w1s + raw["b1"].astype(f32) * s1 + sh1

    # dense2 + bn2, bn0 folded into the first F rows (x0 = x*s0 + t0 enters linearly):
    w2s = raw["w2"].astype(f32) * s2[None, :]
    w2f = jnp.concatenate([s0[:, None] * w2s[:F], w2s[F:]], axis=0)
    t2 = t0 @ w2s[:F] + raw["b2"].astype(f32) * s2 + sh2

    # dense3/4 + bn3/4: standard scale-into-columns fold
    w3f = raw["w3"].astype(f32) * s3[None, :]
    t3 = raw["b3"].astype(f32) * s3 + sh3
    w4f = raw["w4"].astype(f32) * s4[None, :]
    t4 = raw["b4"].astype(f32) * s4 + sh4

    return {
        "w1": w1f.astype(compute_dtype), "t1": t1[None, :].astype(f32),
        "w2": w2f.astype(compute_dtype), "t2": t2[None, :].astype(f32),
        "w3": w3f.astype(compute_dtype), "t3": t3[None, :].astype(f32),
        "w4": w4f.astype(compute_dtype), "t4": t4[None, :].astype(f32),
        "w5": raw["w5"].astype(compute_dtype),
        "b5": raw["b5"][None, :].astype(f32),
    }


def modelv1_forward(x, p, *, tile_b=1024):
    B, F = x.shape
    T = p["b5"].shape[1]
    cdt = p["w1"].dtype

    # Ship activations at the MXU compute dtype (halves the dominant HBM read for bf16).
    x = x.astype(cdt)

    # Batch tile: multiple of 8, capped by the (padded) batch; prefer >=2 tiles so
    # v7x's two TensorCores both get work (no-op on single-TC v5e/v6e).
    B8 = _round_up(B, 8)
    tb = _round_up(min(tile_b, B8), 8)
    if B8 > 8 and tb >= B8:
        tb = _round_up(pl.cdiv(B8, 2), 8)
    B_pad = _round_up(B8, tb)
    if B_pad != B:
        x = jnp.zeros((B_pad, F), x.dtype).at[:B].set(x)
    n_tiles = B_pad // tb

    def resident(arr):
        nd = arr.ndim
        # full-array block with a constant index_map -> stays VMEM-resident
        return pl.BlockSpec(arr.shape, lambda i, nd=nd: (0,) * nd)

    args = (
        x,
        p["w1"], p["t1"],
        p["w2"], p["t2"],
        p["w3"], p["t3"],
        p["w4"], p["t4"],
        p["w5"], p["b5"],
    )
    in_specs = [pl.BlockSpec((tb, F), lambda i: (i, 0))] + [resident(a) for a in args[1:]]
    # Output block uses the true target width T (full last dim is a legal block) ->
    # no 16x writeback inflation from lane padding; masked vst is far cheaper.
    out_spec = pl.BlockSpec((tb, T), lambda i: (i, 0))

    out = pl.pallas_call(
        modelv1_kernel,
        out_shape=jax.ShapeDtypeStruct((B_pad, T), jnp.float32),
        grid_spec=pltpu.PrefetchScalarGridSpec(
            num_scalar_prefetch=0,
            grid=(n_tiles,),
            in_specs=in_specs,
            out_specs=out_spec,
        ),
        compiler_params=pltpu.CompilerParams(
            dimension_semantics=("parallel",),  # shard batch tiles across TCs (v7x)
        ),
    )(*args)
    return out[:B, :]


# ---------------------------------------------------------------------------
# Synthetic parameters + pure-JAX reference (torch eval-mode semantics)
# ---------------------------------------------------------------------------
def make_raw_params(key, num_feat, hidden, num_targets):
    ks = iter(jax.random.split(key, 32))

    def lin(in_f, out_f):
        w = jax.random.normal(next(ks), (in_f, out_f), jnp.float32) / jnp.sqrt(in_f)
        b = 0.01 * jax.random.normal(next(ks), (out_f,), jnp.float32)
        return w, b

    def bn(c):
        g = 1.0 + 0.1 * jax.random.normal(next(ks), (c,), jnp.float32)
        b = 0.1 * jax.random.normal(next(ks), (c,), jnp.float32)
        m = 0.05 * jax.random.normal(next(ks), (c,), jnp.float32)
        v = jnp.abs(1.0 + 0.1 * jax.random.normal(next(ks), (c,), jnp.float32))
        return g, b, m, v

    p = {}
    p["bn0_g"], p["bn0_b"], p["bn0_m"], p["bn0_v"] = bn(num_feat)
    p["w1"], p["b1"] = lin(num_feat, hidden)
    p["bn1_g"], p["bn1_b"], p["bn1_m"], p["bn1_v"] = bn(hidden)
    p["w2"], p["b2"] = lin(hidden + num_feat, hidden)
    p["bn2_g"], p["bn2_b"], p["bn2_m"], p["bn2_v"] = bn(hidden)
    p["w3"], p["b3"] = lin(2 * hidden, hidden)
    p["bn3_g"], p["bn3_b"], p["bn3_m"], p["bn3_v"] = bn(hidden)
    p["w4"], p["b4"] = lin(2 * hidden, hidden)
    p["bn4_g"], p["bn4_b"], p["bn4_m"], p["bn4_v"] = bn(hidden)
    p["w5"], p["b5"] = lin(2 * hidden, num_targets)
    return p


def reference_forward(x, r, eps=1e-5):
    def bn(v, g, b, m, var):
        return (v - m) / jnp.sqrt(var + eps) * g + b

    def lrelu(v):
        return jnp.where(v > 0, v, NEG_SLOPE * v)

    x = bn(x, r["bn0_g"], r["bn0_b"], r["bn0_m"], r["bn0_v"])
    x1 = lrelu(bn(x @ r["w1"] + r["b1"], r["bn1_g"], r["bn1_b"], r["bn1_m"], r["bn1_v"]))
    c = jnp.concatenate([x, x1], 1)
    x2 = lrelu(bn(c @ r["w2"] + r["b2"], r["bn2_g"], r["bn2_b"], r["bn2_m"], r["bn2_v"]))
    c = jnp.concatenate([x1, x2], 1)
    x3 = lrelu(bn(c @ r["w3"] + r["b3"], r["bn3_g"], r["bn3_b"], r["bn3_m"], r["bn3_v"]))
    c = jnp.concatenate([x2, x3], 1)
    x4 = lrelu(bn(c @ r["w4"] + r["b4"], r["bn4_g"], r["bn4_b"], r["bn4_m"], r["bn4_v"]))
    c = jnp.concatenate([x3, x4], 1)
    return c @ r["w5"] + r["b5"]


if __name__ == "__main__":
    B, F, H, T = 8, 32, 64, 8  # batch, all_feat_cols, hidden_size, target_cols

    key = jax.random.PRNGKey(0)
    kx, kp = jax.random.split(key)
    x = jax.random.normal(kx, (B, F), jnp.float32)
    raw = make_raw_params(kp, F, H, T)
    ref = reference_forward(x, raw)

    # f32 path (tight check)
    params = prepare_params(raw, compute_dtype=jnp.float32)
    out = modelv1_forward(x, params)
    jax.block_until_ready(out)
    assert out.shape == (B, T)
    assert jnp.allclose(out, ref, atol=2e-4, rtol=2e-4)

    # bf16 weight/activation path (production path on v6e/v7x MXU; f32 accumulation)
    params_bf16 = prepare_params(raw, compute_dtype=jnp.bfloat16)
    out_bf16 = modelv1_forward(x, params_bf16)
    jax.block_until_ready(out_bf16)
    assert jnp.allclose(out_bf16, ref, atol=1e-1, rtol=1e-1)

    print("KERNEL_OK")
</pallas_src>

<mosaic_0001>
module attributes {stable_mosaic.version = 11 : i64} {
  func.func @modelv1_kernel(%arg0: i32, %arg1: memref<8x32xf32, #tpu.memory_space<vmem>>, %arg2: memref<32x64xf32, #tpu.memory_space<vmem>>, %arg3: memref<1x64xf32, #tpu.memory_space<vmem>>, %arg4: memref<96x64xf32, #tpu.memory_space<vmem>>, %arg5: memref<1x64xf32, #tpu.memory_space<vmem>>, %arg6: memref<128x64xf32, #tpu.memory_space<vmem>>, %arg7: memref<1x64xf32, #tpu.memory_space<vmem>>, %arg8: memref<128x64xf32, #tpu.memory_space<vmem>>, %arg9: memref<1x64xf32, #tpu.memory_space<vmem>>, %arg10: memref<128x8xf32, #tpu.memory_space<vmem>>, %arg11: memref<1x8xf32, #tpu.memory_space<vmem>>, %arg12: memref<8x8xf32, #tpu.memory_space<vmem>>) attributes {dimension_semantics = [#tpu.dimension_semantics<parallel>], iteration_bounds = array<i64: 1>, scalar_prefetch = 0 : i64, scratch_operands = 0 : i64, tpu.core_type = #tpu.core_type<tc>, window_params = [{transform_indices = @transform_0, window_bounds = array<i64: 8, 32>}, {pipeline_mode = #tpu.pipeline_mode<synchronous>, transform_indices = @transform_1, window_bounds = array<i64: 32, 64>}, {pipeline_mode = #tpu.pipeline_mode<synchronous>, transform_indices = @transform_2, window_bounds = array<i64: 1, 64>}, {pipeline_mode = #tpu.pipeline_mode<synchronous>, transform_indices = @transform_3, window_bounds = array<i64: 96, 64>}, {pipeline_mode = #tpu.pipeline_mode<synchronous>, transform_indices = @transform_4, window_bounds = array<i64: 1, 64>}, {pipeline_mode = #tpu.pipeline_mode<synchronous>, transform_indices = @transform_5, window_bounds = array<i64: 128, 64>}, {pipeline_mode = #tpu.pipeline_mode<synchronous>, transform_indices = @transform_6, window_bounds = array<i64: 1, 64>}, {pipeline_mode = #tpu.pipeline_mode<synchronous>, transform_indices = @transform_7, window_bounds = array<i64: 128, 64>}, {pipeline_mode = #tpu.pipeline_mode<synchronous>, transform_indices = @transform_8, window_bounds = array<i64: 1, 64>}, {pipeline_mode = #tpu.pipeline_mode<synchronous>, transform_indices = @transform_9, window_bounds = array<i64: 128, 8>}, {pipeline_mode = #tpu.pipeline_mode<synchronous>, transform_indices = @transform_10, window_bounds = array<i64: 1, 8>}, {transform_indices = @transform_11, window_bounds = array<i64: 8, 8>}]} {
    %c0 = arith.constant 0 : index
    %c0_0 = arith.constant 0 : index
    %0 = vector.load %arg1[%c0, %c0_0] : memref<8x32xf32, #tpu.memory_space<vmem>>, vector<8x32xf32>
    %c0_1 = arith.constant 0 : index
    %c0_2 = arith.constant 0 : index
    %1 = vector.load %arg2[%c0_1, %c0_2] : memref<32x64xf32, #tpu.memory_space<vmem>>, vector<32x64xf32>
    %cst = arith.constant dense<0.000000e+00> : vector<8x64xf32>
    %2 = tpu.matmul %0, %1, %cst {dimension_numbers = #tpu.dot_dimension_numbers<[1], [0], [0], [1], [0, 0, 1, 1], [], []>} : vector<8x32xf32>, vector<32x64xf32>, vector<8x64xf32> -> vector<8x64xf32>
    %c0_3 = arith.constant 0 : index
    %c0_4 = arith.constant 0 : index
    %3 = vector.load %arg3[%c0_3, %c0_4] : memref<1x64xf32, #tpu.memory_space<vmem>>, vector<1x64xf32>
    %4 = vector.broadcast %3 : vector<1x64xf32> to vector<8x64xf32>
    %5 = arith.addf %2, %4 : vector<8x64xf32>
    %cst_5 = arith.constant 0.00999999977 : f32
    %6 = vector.broadcast %cst_5 : f32 to vector<8x64xf32>
    %7 = arith.mulf %6, %5 : vector<8x64xf32>
    %8 = arith.maximumf %5, %7 : vector<8x64xf32>
    %9 = tpu.concatenate %0, %8 in 1 : vector<8x32xf32>, vector<8x64xf32> -> vector<8x96xf32>
    %c0_6 = arith.constant 0 : index
    %c0_7 = arith.constant 0 : index
    %10 = vector.load %arg4[%c0_6, %c0_7] : memref<96x64xf32, #tpu.memory_space<vmem>>, vector<96x64xf32>
    %cst_8 = arith.constant dense<0.000000e+00> : vector<8x64xf32>
    %11 = tpu.matmul %9, %10, %cst_8 {dimension_numbers = #tpu.dot_dimension_numbers<[1], [0], [0], [1], [0, 0, 1, 1], [], []>} : vector<8x96xf32>, vector<96x64xf32>, vector<8x64xf32> -> vector<8x64xf32>
    %c0_9 = arith.constant 0 : index
    %c0_10 = arith.constant 0 : index
    %12 = vector.load %arg5[%c0_9, %c0_10] : memref<1x64xf32, #tpu.memory_space<vmem>>, vector<1x64xf32>
    %13 = vector.broadcast %12 : vector<1x64xf32> to vector<8x64xf32>
    %14 = arith.addf %11, %13 : vector<8x64xf32>
    %cst_11 = arith.constant 0.00999999977 : f32
    %15 = vector.broadcast %cst_11 : f32 to vector<8x64xf32>
    %16 = arith.mulf %15, %14 : vector<8x64xf32>
    %17 = arith.maximumf %14, %16 : vector<8x64xf32>
    %18 = tpu.concatenate %8, %17 in 1 : vector<8x64xf32>, vector<8x64xf32> -> vector<8x128xf32>
    %c0_12 = arith.constant 0 : index
    %c0_13 = arith.constant 0 : index
    %19 = vector.load %arg6[%c0_12, %c0_13] : memref<128x64xf32, #tpu.memory_space<vmem>>, vector<128x64xf32>
    %cst_14 = arith.constant dense<0.000000e+00> : vector<8x64xf32>
    %20 = tpu.matmul %18, %19, %cst_14 {dimension_numbers = #tpu.dot_dimension_numbers<[1], [0], [0], [1], [0, 0, 1, 1], [], []>} : vector<8x128xf32>, vector<128x64xf32>, vector<8x64xf32> -> vector<8x64xf32>
    %c0_15 = arith.constant 0 : index
    %c0_16 = arith.constant 0 : index
    %21 = vector.load %arg7[%c0_15, %c0_16] : memref<1x64xf32, #tpu.memory_space<vmem>>, vector<1x64xf32>
    %22 = vector.broadcast %21 : vector<1x64xf32> to vector<8x64xf32>
    %23 = arith.addf %20, %22 : vector<8x64xf32>
    %cst_17 = arith.constant 0.00999999977 : f32
    %24 = vector.broadcast %cst_17 : f32 to vector<8x64xf32>
    %25 = arith.mulf %24, %23 : vector<8x64xf32>
    %26 = arith.maximumf %23, %25 : vector<8x64xf32>
    %27 = tpu.concatenate %17, %26 in 1 : vector<8x64xf32>, vector<8x64xf32> -> vector<8x128xf32>
    %c0_18 = arith.constant 0 : index
    %c0_19 = arith.constant 0 : index
    %28 = vector.load %arg8[%c0_18, %c0_19] : memref<128x64xf32, #tpu.memory_space<vmem>>, vector<128x64xf32>
    %cst_20 = arith.constant dense<0.000000e+00> : vector<8x64xf32>
    %29 = tpu.matmul %27, %28, %cst_20 {dimension_numbers = #tpu.dot_dimension_numbers<[1], [0], [0], [1], [0, 0, 1, 1], [], []>} : vector<8x128xf32>, vector<128x64xf32>, vector<8x64xf32> -> vector<8x64xf32>
    %c0_21 = arith.constant 0 : index
    %c0_22 = arith.constant 0 : index
    %30 = vector.load %arg9[%c0_21, %c0_22] : memref<1x64xf32, #tpu.memory_space<vmem>>, vector<1x64xf32>
    %31 = vector.broadcast %30 : vector<1x64xf32> to vector<8x64xf32>
    %32 = arith.addf %29, %31 : vector<8x64xf32>
    %cst_23 = arith.constant 0.00999999977 : f32
    %33 = vector.broadcast %cst_23 : f32 to vector<8x64xf32>
    %34 = arith.mulf %33, %32 : vector<8x64xf32>
    %35 = arith.maximumf %32, %34 : vector<8x64xf32>
    %36 = tpu.concatenate %26, %35 in 1 : vector<8x64xf32>, vector<8x64xf32> -> vector<8x128xf32>
    %c0_24 = arith.constant 0 : index
    %c0_25 = arith.constant 0 : index
    %37 = vector.load %arg10[%c0_24, %c0_25] : memref<128x8xf32, #tpu.memory_space<vmem>>, vector<128x8xf32>
    %cst_26 = arith.constant dense<0.000000e+00> : vector<8x8xf32>
    %38 = tpu.matmul %36, %37, %cst_26 {dimension_numbers = #tpu.dot_dimension_numbers<[1], [0], [0], [1], [0, 0, 1, 1], [], []>} : vector<8x128xf32>, vector<128x8xf32>, vector<8x8xf32> -> vector<8x8xf32>
    %c0_27 = arith.constant 0 : index
    %c0_28 = arith.constant 0 : index
    %39 = vector.load %arg11[%c0_27, %c0_28] : memref<1x8xf32, #tpu.memory_space<vmem>>, vector<1x8xf32>
    %40 = vector.broadcast %39 : vector<1x8xf32> to vector<8x8xf32>
    %41 = arith.addf %38, %40 : vector<8x8xf32>
    %c0_29 = arith.constant 0 : index
    %c0_30 = arith.constant 0 : index
    %42 = vector.load %arg12[%c0_29, %c0_30] : memref<8x8xf32, #tpu.memory_space<vmem>>, vector<8x8xf32>
    tpu.vector_store %arg12[%c0_29, %c0_30], %41 {strides = array<i32>} : memref<8x8xf32, #tpu.memory_space<vmem>>, vector<8x8xf32>,
    return
  }
  func.func @transform_0(%arg0: i32) -> (i32, i32) {
    %c0_i32 = arith.constant 0 : i32
    %c0_i32_0 = arith.constant 0 : i32
    return %arg0, %c0_i32 : i32, i32
  }
  func.func @transform_1(%arg0: i32) -> (i32, i32) {
    %c0_i32 = arith.constant 0 : i32
    %c0_i32_0 = arith.constant 0 : i32
    %c0_i32_1 = arith.constant 0 : i32
    return %c0_i32, %c0_i32_0 : i32, i32
  }
  func.func @transform_2(%arg0: i32) -> (i32, i32) {
    %c0_i32 = arith.constant 0 : i32
    %c0_i32_0 = arith.constant 0 : i32
    %c0_i32_1 = arith.constant 0 : i32
    return %c0_i32, %c0_i32_0 : i32, i32
  }
  func.func @transform_3(%arg0: i32) -> (i32, i32) {
    %c0_i32 = arith.constant 0 : i32
    %c0_i32_0 = arith.constant 0 : i32
    %c0_i32_1 = arith.constant 0 : i32
    return %c0_i32, %c0_i32_0 : i32, i32
  }
  func.func @transform_4(%arg0: i32) -> (i32, i32) {
    %c0_i32 = arith.constant 0 : i32
    %c0_i32_0 = arith.constant 0 : i32
    %c0_i32_1 = arith.constant 0 : i32
    return %c0_i32, %c0_i32_0 : i32, i32
  }
  func.func @transform_5(%arg0: i32) -> (i32, i32) {
    %c0_i32 = arith.constant 0 : i32
    %c0_i32_0 = arith.constant 0 : i32
    %c0_i32_1 = arith.constant 0 : i32
    return %c0_i32, %c0_i32_0 : i32, i32
  }
  func.func @transform_6(%arg0: i32) -> (i32, i32) {
    %c0_i32 = arith.constant 0 : i32
    %c0_i32_0 = arith.constant 0 : i32
    %c0_i32_1 = arith.constant 0 : i32
    return %c0_i32, %c0_i32_0 : i32, i32
  }
  func.func @transform_7(%arg0: i32) -> (i32, i32) {
    %c0_i32 = arith.constant 0 : i32
    %c0_i32_0 = arith.constant 0 : i32
    %c0_i32_1 = arith.constant 0 : i32
    return %c0_i32, %c0_i32_0 : i32, i32
  }
  func.func @transform_8(%arg0: i32) -> (i32, i32) {
    %c0_i32 = arith.constant 0 : i32
    %c0_i32_0 = arith.constant 0 : i32
    %c0_i32_1 = arith.constant 0 : i32
    return %c0_i32, %c0_i32_0 : i32, i32
  }
  func.func @transform_9(%arg0: i32) -> (i32, i32) {
    %c0_i32 = arith.constant 0 : i32
    %c0_i32_0 = arith.constant 0 : i32
    %c0_i32_1 = arith.constant 0 : i32
    return %c0_i32, %c0_i32_0 : i32, i32
  }
  func.func @transform_10(%arg0: i32) -> (i32, i32) {
    %c0_i32 = arith.constant 0 : i32
    %c0_i32_0 = arith.constant 0 : i32
    %c0_i32_1 = arith.constant 0 : i32
    return %c0_i32, %c0_i32_0 : i32, i32
  }
  func.func @transform_11(%arg0: i32) -> (i32, i32) {
    %c0_i32 = arith.constant 0 : i32
    %c0_i32_0 = arith.constant 0 : i32
    return %arg0, %c0_i32 : i32, i32
  }
}

</mosaic_0001>

<bundles_post_ra>
// kernel: tpu_custom_call.1
= control target key start
LH: loop header
LB: loop body
LE: loop exit
PB: predicated region body
PF: predicated region fallthrough
CT: control target
= control target key end

     0   :  { %v788_v1 = vmov 0.0   ;;  %vm789_vm0 = vmmov 0   ;;  %s1156_s0 = inlined_call_operand.vmem [shape: f32[8,32], index: 0, kind: input, shape index: {}]   ;;  %s1157_s1 = inlined_call_operand.vmem [shape: f32[32,64], index: 1, kind: input, shape index: {}]   ;;  %s1158_s2 = inlined_call_operand.vmem [shape: f32[1,64], index: 2, kind: input, shape index: {}]   ;;  %s1159_s3 = inlined_call_operand.vmem [shape: f32[96,64], index: 3, kind: input, shape index: {}]   ;;  %s1160_s4 = inlined_call_operand.vmem [shape: f32[1,64], index: 4, kind: input, shape index: {}]   ;;  %s1161_s5 = inlined_call_operand.vmem [shape: f32[128,64], index: 5, kind: input, shape index: {}]   ;;  %s1162_s6 = inlined_call_operand.vmem [shape: f32[1,64], index: 6, kind: input, shape index: {}]   ;;  %s1163_s7 = inlined_call_operand.vmem [shape: f32[128,64], index: 7, kind: input, shape index: {}]   ;;  %s1164_s8 = inlined_call_operand.vmem [shape: f32[1,64], index: 8, kind: input, shape index: {}]   ;;  %s1165_s9 = inlined_call_operand.vmem [shape: f32[128,8], index: 9, kind: input, shape index: {}]   ;;  %s1166_s10 = inlined_call_operand.vmem [shape: f32[1,8], index: 10, kind: input, shape index: {}]   ;;  %s1167_s11 = inlined_call_operand.hbm [shape: f32[8,8], index: 11, kind: output, shape index: {}]  }
   0x1   :  { %v43_v0 = vld [vmem:[%s1157_s1 + $0x18] sm:$0xff]  ;;  %618 = vmatprep.subr.mxu1 %v788_v1  ;;  %v42_v2 = vld [vmem:[%s1157_s1 + $0x10] sm:$0xff]  ;;  %626 = vmatprep.mubr.msk.f32.mxu1 %vm789_vm0, %v788_v1 }
   0x2   :  { %619 = vmatpush3.msra.mxu1 %v43_v0  ;;  %656 = vmatprep.subr.mxu0 %v788_v1 }
   0x3   :  { %16 = vsyncpa [#allocation3], 0  ;;  %620 = vmatprep.subr.mxu1 %v788_v1  ;;  %v41_v3 = vld [vmem:[%s1157_s1 + $0x8] sm:$0xff]  ;;  %688 = vmatprep.mubr.msk.f32.mxu0 %vm789_vm0, %v788_v1  ;;  %v40_v4 = vld [vmem:[%s1157_s1] sm:$0xff]  ;;  %vm51_vm1 = vcmask 261120   ;;  %s790_s30 = smov 32  }
   0x4   :  { %621 = vmatpush3.msra.mxu1 %v42_v2  ;;  %v39_v5 = vld [vmem:[%s1156_s0] sm:$0xff]  ;;  %v143_v6 = vld [vmem:[%s1159_s3 + $0x58] sm:$0xff]  ;;  %v142_v7 = vld [vmem:[%s1159_s3 + $0x50] sm:$0xff]  ;;  %vm151_vm2 = vcmask 785408   ;;  %s791_s21 = smov 64   ;;  %vm231_vm3 = vcmask 523264  }
   0x5   :  { %622 = vmatprep.subr.mxu1 %v788_v1  ;;  %v141_v8 = vld [vmem:[%s1159_s3 + $0x48] sm:$0xff]  ;;  %v140_v9 = vld [vmem:[%s1159_s3 + $0x40] sm:$0xff]  ;;  %v139_v10 = vld [vmem:[%s1159_s3 + $0x38] sm:$0xff]  ;;  %vm526_vm4 = vcmask 64512  }
   0x6   :  { %623 = vmatpush3.msra.mxu1 %v41_v3  ;;  %v138_v11 = vld [vmem:[%s1159_s3 + $0x30] sm:$0xff]  ;;  %v137_v12 = vld [vmem:[%s1159_s3 + $0x28] sm:$0xff]  ;;  %v136_v13 = vld [vmem:[%s1159_s3 + $0x20] sm:$0xff] }
   0x7   :  { %624 = vmatprep.subr.mxu1 %v788_v1  ;;  %v135_v14 = vld [vmem:[%s1159_s3 + $0x18] sm:$0xff]  ;;  %v134_v15 = vld [vmem:[%s1159_s3 + $0x10] sm:$0xff]  ;;  %v133_v16 = vld [vmem:[%s1159_s3 + $0x8] sm:$0xff] }
   0x8   :  { %625 = vmatpush3.msra.mxu1 %v40_v4  ;;  %v132_v17 = vld [vmem:[%s1159_s3] sm:$0xff]  ;;  %v248_v26 = vld [vmem:[%s1161_s5 + $0x78] sm:$0xff]  ;;  %v247_v27 = vld [vmem:[%s1161_s5 + $0x70] sm:$0xff] }
   0x9   :  { %627 = vmatmul.mubr.msk.f32.vlgmr.msra.gmra.mxu1 %vm51_vm1, %v39_v5  ;;  %629 = vmatprep.subr.mxu1 %v788_v1  ;;  %v542_v18 = vld [vmem:[%s1158_s2] ss:$0 sm:$0xff]  ;;  %v246_v28 = vld [vmem:[%s1161_s5 + $0x68] sm:$0xff]  ;;  %v244_v30 = vld [vmem:[%s1161_s5 + $0x58] sm:$0xff] }
   0xa   :  { %653 = vmatprep.mubr.msk.f32.mxu1 %vm789_vm0, %v788_v1  ;;  %630 = vmatpush3.msra.mxu1 %v143_v6  ;;  %v245_v29 = vld [vmem:[%s1161_s5 + $0x60] sm:$0xff]  ;;  %v243_v31 = vld [vmem:[%s1161_s5 + $0x50] sm:$0xff]  ;;  %v242_v32 = vld [vmem:[%s1161_s5 + $0x48] sm:$0xff] }
   0xb   :  { %631 = vmatprep.subr.mxu1 %v788_v1  ;;  %657 = vmatpush3.msra.mxu0 %v248_v26  ;;  %v241_v33 = vld [vmem:[%s1161_s5 + $0x40] sm:$0xff]  ;;  %v240_v34 = vld [vmem:[%s1161_s5 + $0x38] sm:$0xff]  ;;  %v239_v35 = vld [vmem:[%s1161_s5 + $0x30] sm:$0xff] }
   0xc   :  { %632 = vmatpush3.msra.mxu1 %v142_v7  ;;  %658 = vmatprep.subr.mxu0 %v788_v1  ;;  %v238_v36 = vld [vmem:[%s1161_s5 + $0x28] sm:$0xff]  ;;  %v237_v37 = vld [vmem:[%s1161_s5 + $0x20] sm:$0xff]  ;;  %v236_v38 = vld [vmem:[%s1161_s5 + $0x18] sm:$0xff] }
   0xd   :  { %633 = vmatprep.subr.mxu1 %v788_v1  ;;  %659 = vmatpush3.msra.mxu0 %v247_v27  ;;  %v235_v39 = vld [vmem:[%s1161_s5 + $0x10] sm:$0xff]  ;;  %v234_v40 = vld [vmem:[%s1161_s5 + $0x8] sm:$0xff]  ;;  %v233_v41 = vld [vmem:[%s1161_s5] sm:$0xff] }
   0xe   :  { %634 = vmatpush3.msra.mxu1 %v141_v8  ;;  %660 = vmatprep.subr.mxu0 %v788_v1  ;;  %v544_v42 = vld [vmem:[%s1160_s4] ss:$0 sm:$0xff]  ;;  %v348_v50 = vld [vmem:[%s1163_s7 + $0x78] sm:$0xff]  ;;  %v347_v51 = vld [vmem:[%s1163_s7 + $0x70] sm:$0xff] }
   0xf   :  { %635 = vmatprep.subr.mxu1 %v788_v1  ;;  %661 = vmatpush3.msra.mxu0 %v246_v28  ;;  %v346_v52 = vld [vmem:[%s1163_s7 + $0x68] sm:$0xff]  ;;  %v345_v53 = vld [vmem:[%s1163_s7 + $0x60] sm:$0xff]  ;;  %v344_v54 = vld [vmem:[%s1163_s7 + $0x58] sm:$0xff] }
  0x10   :  { %636 = vmatpush3.msra.mxu1 %v140_v9  ;;  %662 = vmatprep.subr.mxu0 %v788_v1  ;;  %v343_v55 = vld [vmem:[%s1163_s7 + $0x50] sm:$0xff]  ;;  %v342_v56 = vld [vmem:[%s1163_s7 + $0x48] sm:$0xff]  ;;  %v341_v57 = vld [vmem:[%s1163_s7 + $0x40] sm:$0xff] }
  0x11   :  { %637 = vmatprep.subr.mxu1 %v788_v1  ;;  %663 = vmatpush3.msra.mxu0 %v245_v29  ;;  %v340_v58 = vld [vmem:[%s1163_s7 + $0x38] sm:$0xff]  ;;  %v339_v59 = vld [vmem:[%s1163_s7 + $0x30] sm:$0xff]  ;;  %v338_v60 = vld [vmem:[%s1163_s7 + $0x28] sm:$0xff] }
  0x12   :  { %638 = vmatpush3.msra.mxu1 %v139_v10  ;;  %664 = vmatprep.subr.mxu0 %v788_v1  ;;  %v337_v61 = vld [vmem:[%s1163_s7 + $0x20] sm:$0xff]  ;;  %v336_v62 = vld [vmem:[%s1163_s7 + $0x18] sm:$0xff]  ;;  %v335_v63 = vld [vmem:[%s1163_s7 + $0x10] sm:$0xff] }
  0x13   :  { %639 = vmatprep.subr.mxu1 %v788_v1  ;;  %665 = vmatpush3.msra.mxu0 %v244_v30  ;;  %v334_v0 = vld [vmem:[%s1163_s7 + $0x8] sm:$0xff]  ;;  %v333_v2 = vld [vmem:[%s1163_s7] sm:$0xff] }
  0x14   :  { %640 = vmatpush3.msra.mxu1 %v138_v11  ;;  %666 = vmatprep.subr.mxu0 %v788_v1  ;;  %v546_v3 = vld [vmem:[%s1162_s6] ss:$0 sm:$0xff]  ;;  %v448_v11 = vld [vmem:[%s1165_s9 + $0x78] sm:$0xff] }
  0x15   :  { %641 = vmatprep.subr.mxu1 %v788_v1  ;;  %667 = vmatpush3.msra.mxu0 %v243_v31  ;;  %v433_v26 = vld [vmem:[%s1165_s9] sm:$0xff] }
  0x16   :  { %642 = vmatpush3.msra.mxu1 %v137_v12  ;;  %668 = vmatprep.subr.mxu0 %v788_v1  ;;  %v447_v12 = vld [vmem:[%s1165_s9 + $0x70] sm:$0xff]  ;;  %v547_v27 = vld [vmem:[%s1164_s8] ss:$0 sm:$0xff] }
  0x17   :  { %643 = vmatprep.subr.mxu1 %v788_v1  ;;  %669 = vmatpush3.msra.mxu0 %v242_v32 }
  0x18   :  { %644 = vmatpush3.msra.mxu1 %v136_v13  ;;  %670 = vmatprep.subr.mxu0 %v788_v1  ;;  %v446_v13 = vld [vmem:[%s1165_s9 + $0x68] sm:$0xff] }
  0x19   :  { %645 = vmatprep.subr.mxu1 %v788_v1  ;;  %671 = vmatpush3.msra.mxu0 %v241_v33 }
  0x1a   :  { %646 = vmatpush3.msra.mxu1 %v135_v14  ;;  %672 = vmatprep.subr.mxu0 %v788_v1  ;;  %v445_v14 = vld [vmem:[%s1165_s9 + $0x60] sm:$0xff] }
  0x1b   :  { %647 = vmatprep.subr.mxu1 %v788_v1  ;;  %673 = vmatpush3.msra.mxu0 %v240_v34 }
  0x1c   :  { %648 = vmatpush3.msra.mxu1 %v134_v15  ;;  %674 = vmatprep.subr.mxu0 %v788_v1  ;;  %v444_v15 = vld [vmem:[%s1165_s9 + $0x58] sm:$0xff] }
  0x1d   :  { %649 = vmatprep.subr.mxu1 %v788_v1  ;;  %675 = vmatpush3.msra.mxu0 %v239_v35 }
  0x1e   :  { %650 = vmatpush3.msra.mxu1 %v133_v16  ;;  %676 = vmatprep.subr.mxu0 %v788_v1  ;;  %v443_v16 = vld [vmem:[%s1165_s9 + $0x50] sm:$0xff] }
  0x1f   :  { %651 = vmatprep.subr.mxu1 %v788_v1  ;;  %677 = vmatpush3.msra.mxu0 %v238_v36 }
  0x20   :  { %652 = vmatpush3.msra.mxu1 %v132_v17  ;;  %678 = vmatprep.subr.mxu0 %v788_v1  ;;  %v442_v17 = vld [vmem:[%s1165_s9 + $0x48] sm:$0xff] }
  0x21   :  { %691 = vmatprep.subr.mxu1 %v788_v1  ;;  %679 = vmatpush3.msra.mxu0 %v237_v37 }
  0x22   :  { %680 = vmatprep.subr.mxu0 %v788_v1 }
  0x23   :  { %681 = vmatpush3.msra.mxu0 %v236_v38 }
  0x24   :  { %682 = vmatprep.subr.mxu0 %v788_v1 }
  0x25   :  { %683 = vmatpush3.msra.mxu0 %v235_v39 }
  0x26   :  { %684 = vmatprep.subr.mxu0 %v788_v1 }
  0x27   :  { %685 = vmatpush3.msra.mxu0 %v234_v40 }
  0x28   :  { %686 = vmatprep.subr.mxu0 %v788_v1 }
  0x29   :  { %687 = vmatpush3.msra.mxu0 %v233_v41 }
  0x2a   :  { %726 = vmatprep.subr.mxu0 %v788_v1 }
  0xc9   :  { %v121_v19 = vpop.f32.mrf.mxu1 }
  0xca   :  { %v122_v20 = vadd.f32 %v542_v18, %v121_v19  ;;  %v441_v18 = vld [vmem:[%s1165_s9 + $0x40] sm:$0xff]  ;;  %v440_v19 = vld [vmem:[%s1165_s9 + $0x38] sm:$0xff] }
  0xcb   :  { %v628_v21 = vpop.f32.mrf.mxu1 }
  0xcc   :  { %v125_v22 = vmul.f32 0.01, %v122_v20  ;;  %v438_v21 = vld [vmem:[%s1165_s9 + $0x28] sm:$0xff] }
  0xce   :  { %v932_v23 = vmax.f32 %v122_v20, %v125_v22  ;;  %v439_v20 = vld [vmem:[%s1165_s9 + $0x30] sm:$0xff]  ;;  %v437_v22 = vld [vmem:[%s1165_s9 + $0x20] sm:$0xff] }
  0xd0   :  { %128 = vrot.lane.b32.xlu0 %v932_v23, %s790_s30 }
 0x142   :  { %v129_v24 = vpop.permute.xlu0 %128 }
 0x143   :  { %v131_v25 = vsel %vm51_vm1, %v39_v5, %v129_v24  ;;  %v435_v24 = vld [vmem:[%s1165_s9 + $0x10] sm:$0xff] }
 0x144   :  { %654 = vmatmul.mubr.msk.f32.vlgmr.msra.gmra.mxu1 %vm151_vm2, %v131_v25  ;;  %v434_v25 = vld [vmem:[%s1165_s9 + $0x8] sm:$0xff] }
 0x145   :  { %723 = vmatprep.mubr.msk.f32.mxu1 %vm789_vm0, %v788_v1  ;;  %692 = vmatpush3.msra.mxu1 %v348_v50 }
 0x146   :  { %693 = vmatprep.subr.mxu1 %v788_v1 }
 0x147   :  { %694 = vmatpush3.msra.mxu1 %v347_v51 }
 0x148   :  { %695 = vmatprep.subr.mxu1 %v788_v1 }
 0x149   :  { %696 = vmatpush3.msra.mxu1 %v346_v52 }
 0x14a   :  { %697 = vmatprep.subr.mxu1 %v788_v1 }
 0x14b   :  { %698 = vmatpush3.msra.mxu1 %v345_v53 }
 0x14c   :  { %699 = vmatprep.subr.mxu1 %v788_v1 }
 0x14d   :  { %700 = vmatpush3.msra.mxu1 %v344_v54 }
 0x14e   :  { %701 = vmatprep.subr.mxu1 %v788_v1 }
 0x14f   :  { %702 = vmatpush3.msra.mxu1 %v343_v55 }
 0x150   :  { %703 = vmatprep.subr.mxu1 %v788_v1 }
 0x151   :  { %704 = vmatpush3.msra.mxu1 %v342_v56 }
 0x152   :  { %705 = vmatprep.subr.mxu1 %v788_v1 }
 0x153   :  { %706 = vmatpush3.msra.mxu1 %v341_v57 }
 0x154   :  { %707 = vmatprep.subr.mxu1 %v788_v1 }
 0x155   :  { %708 = vmatpush3.msra.mxu1 %v340_v58 }
 0x156   :  { %709 = vmatprep.subr.mxu1 %v788_v1 }
 0x157   :  { %710 = vmatpush3.msra.mxu1 %v339_v59 }
 0x158   :  { %711 = vmatprep.subr.mxu1 %v788_v1 }
 0x159   :  { %712 = vmatpush3.msra.mxu1 %v338_v60 }
 0x15a   :  { %713 = vmatprep.subr.mxu1 %v788_v1 }
 0x15b   :  { %714 = vmatpush3.msra.mxu1 %v337_v61 }
 0x15c   :  { %715 = vmatprep.subr.mxu1 %v788_v1 }
 0x15d   :  { %716 = vmatpush3.msra.mxu1 %v336_v62 }
 0x15e   :  { %717 = vmatprep.subr.mxu1 %v788_v1 }
 0x15f   :  { %718 = vmatpush3.msra.mxu1 %v335_v63 }
 0x160   :  { %719 = vmatprep.subr.mxu1 %v788_v1 }
 0x161   :  { %720 = vmatpush3.msra.mxu1 %v334_v0 }
 0x162   :  { %721 = vmatprep.subr.mxu1 %v788_v1 }
 0x163   :  { %722 = vmatpush3.msra.mxu1 %v333_v2 }
 0x204   :  { %v221_v43 = vpop.f32.mrf.mxu1 }
 0x205   :  { %v222_v44 = vadd.f32 %v544_v42, %v221_v43 }
 0x206   :  { %v655_v45 = vpop.f32.mrf.mxu1 }
 0x207   :  { %v225_v46 = vmul.f32 0.01, %v222_v44 }
 0x209   :  { %v1005_v47 = vmax.f32 %v222_v44, %v225_v46 }
 0x20b   :  { %228 = vrot.lane.b32.xlu0 %v1005_v47, %s791_s21 }
 0x27d   :  { %v229_v48 = vpop.permute.xlu0 %228 }
 0x27e   :  { %v232_v49 = vsel %vm231_vm3, %v932_v23, %v229_v48  ;;  %v436_v23 = vld [vmem:[%s1165_s9 + $0x18] sm:$0xff]  ;;  %s792_s9 = smov [#allocation2]  }
 0x27f   :  { %689 = vmatmul.mubr.f32.vlgmr.msra.gmra.mxu0 %v232_v49  ;;  %s534_s15 = sshll.u32 %s792_s9, 4  ;;  %s535_s15 = int_to_ptr.vmem [resolvable:$true] %s534_s15 }
 0x280   :  { %758 = vmatprep.mubr.msk.f32.mxu0 %vm789_vm0, %v788_v1  ;;  %727 = vmatpush3.msra.mxu0 %v448_v11  ;;  %s766_s8 = scalar_lea.vmem %s535_s15, 128  ;;  %p771_p1 = scmp.lt.s32.totalorder %s535_s15, %s535_s15 }
 0x281   :  { %728 = vmatprep.subr.mxu0 %v788_v1  ;;  %p767_p0 = scmp.ne.s32.totalorder %s535_s15, %s766_s8  ;;  %p772_p2 = scmp.lt.s32.totalorder %s766_s8, %s766_s8 }
 0x282   :  { %729 = vmatpush3.msra.mxu0 %v447_v12 }
 0x283   :  { %730 = vmatprep.subr.mxu0 %v788_v1  ;;  %p773_p3 = por %p772_p2, %p771_p1 }
 0x284   :  { %731 = vmatpush3.msra.mxu0 %v446_v13 }
 0x285   :  { %732 = vmatprep.subr.mxu0 %v788_v1  ;;  %p774_p4 = pnand %p773_p3, %p767_p0 }
 0x286   :  { %733 = vmatpush3.msra.mxu0 %v445_v14 }
 0x287   :  { %734 = vmatprep.subr.mxu0 %v788_v1 }
 0x288   :  { %735 = vmatpush3.msra.mxu0 %v444_v15 }
 0x289   :  { %736 = vmatprep.subr.mxu0 %v788_v1 }
 0x28a   :  { %737 = vmatpush3.msra.mxu0 %v443_v16 }
 0x28b   :  { %738 = vmatprep.subr.mxu0 %v788_v1 }
 0x28c   :  { %739 = vmatpush3.msra.mxu0 %v442_v17 }
 0x28d   :  { %740 = vmatprep.subr.mxu0 %v788_v1 }
 0x28e   :  { %741 = vmatpush3.msra.mxu0 %v441_v18 }
 0x28f   :  { %742 = vmatprep.subr.mxu0 %v788_v1 }
 0x290   :  { %743 = vmatpush3.msra.mxu0 %v440_v19 }
 0x291   :  { %744 = vmatprep.subr.mxu0 %v788_v1 }
 0x292   :  { %745 = vmatpush3.msra.mxu0 %v439_v20 }
 0x293   :  { %746 = vmatprep.subr.mxu0 %v788_v1 }
 0x294   :  { %747 = vmatpush3.msra.mxu0 %v438_v21 }
 0x295   :  { %748 = vmatprep.subr.mxu0 %v788_v1 }
 0x296   :  { %749 = vmatpush3.msra.mxu0 %v437_v22 }
 0x297   :  { %750 = vmatprep.subr.mxu0 %v788_v1 }
 0x298   :  { %751 = vmatpush3.msra.mxu0 %v436_v23 }
 0x299   :  { %752 = vmatprep.subr.mxu0 %v788_v1 }
 0x29a   :  { %753 = vmatpush3.msra.mxu0 %v435_v24 }
 0x29b   :  { %754 = vmatprep.subr.mxu0 %v788_v1 }
 0x29c   :  { %755 = vmatpush3.msra.mxu0 %v434_v25 }
 0x29d   :  { %756 = vmatprep.subr.mxu0 %v788_v1  ;;  %v548_v1 = vld [vmem:[%s1166_s10] ss:$0 sm:$0xff] }
 0x29e   :  { %757 = vmatpush3.msra.mxu0 %v433_v26 }
 0x33f   :  { %v322_v4 = vpop.f32.mrf.mxu0 }
 0x340   :  { %v323_v5 = vadd.f32 %v546_v3, %v322_v4 }
 0x341   :  { %v690_v6 = vpop.f32.mrf.mxu0 }
 0x342   :  { %v326_v7 = vmul.f32 0.01, %v323_v5 }
 0x344   :  { %v327_v8 = vmax.f32 %v323_v5, %v326_v7 }
 0x346   :  { %329 = vrot.lane.b32.xlu1 %v327_v8, %s791_s21 }
 0x3b8   :  { %v330_v9 = vpop.permute.xlu1 %329 }
 0x3b9   :  { %v332_v10 = vsel %vm231_vm3, %v1005_v47, %v330_v9 }
 0x3ba   :  { %724 = vmatmul.mubr.f32.vlgmr.msra.gmra.mxu1 %v332_v10 }
 0x47a   :  { %v422_v28 = vpop.f32.mrf.mxu1 }
 0x47b   :  { %v423_v29 = vadd.f32 %v547_v27, %v422_v28 }
 0x47c   :  { %v725_v30 = vpop.f32.mrf.mxu1 }
 0x47d   :  { %v426_v31 = vmul.f32 0.01, %v423_v29 }
 0x47f   :  { %v427_v32 = vmax.f32 %v423_v29, %v426_v31 }
 0x481   :  { %429 = vrot.lane.b32.xlu1 %v427_v32, %s791_s21 }
 0x4f3   :  { %v430_v33 = vpop.permute.xlu1 %429 }
 0x4f4   :  { %v432_v34 = vsel %vm231_vm3, %v327_v8, %v430_v33 }
 0x4f5   :  { %759 = vmatmul.mubr.f32.vlgmr.msra.gmra.mxu0 %v432_v34 }
 0x5b5   :  { %v522_v35 = vpop.f32.mrf.mxu0 }
 0x5b6   :  { %v523_v36 = vadd.f32 %v548_v1, %v522_v35 }
 0x5b7   :  { %v760_v37 = vpop.f32.mrf.mxu0 }
 0x5b8   :  { %527 = vst.msk [vmem:[#allocation2] sm:$0xff] %vm526_vm4, %v523_v36 }
 0x5b9   :  { %777 = shalt.err (!%p774_p4)
}
 0x5ba   :  { %537 = dma.vmem_to_hbm [thread:$0]  %s535_s15, 128, %s1167_s11, [#allocation3]  }
 0x5bb   :  { %786 = dma.done.wait [#allocation3], 128  }
 0x5bc   :  { %787 = vsyncadd [#allocation3], 4294967168 }
 0x5bd   :  { %541 = vsyncpa [#allocation3], 1 }

</bundles_post_ra>
